<compile_context>
chip_gen: v7x
topology: tpu7x:2x2x1
jax: 0.10.0
libtpu: 0.0.40
codegen_flags: <defaults>
</compile_context>

<pallas_src>
import functools
import math

import jax
import jax.numpy as jnp
from jax import lax
from jax.experimental import pallas as pl
from jax.experimental.pallas import tpu as pltpu

HIDDEN = 64
LANE = 128
TILE_B_MAX = 2048   # ~5 MiB VMEM footprint at 2048 -> safe under v5e's 16 MiB default
NEG_PAD = -1e30     # value for padded b3 columns so they never win max/argmax


def _round_up(x, m):
    return ((x + m - 1) // m) * m


# ----------------------------- kernel bodies --------------------------------

def _mlp_block(x, w1_ref, b1_ref, w2_ref, b2_ref, w3_ref, b3_ref):
    """Shared 3-layer MLP forward for one batch tile. Returns f32 q [TB, PAD_A]."""
    # fc1 + ReLU on the VPU: state_size is tiny (K=2), broadcast FMAs beat a
    # nearly-empty MXU matmul.
    w1 = w1_ref[...].astype(jnp.float32)
    h1 = x[:, 0:1] * w1[0:1, :]
    for k in range(1, x.shape[1]):                   # static unroll (small K)
        h1 = h1 + x[:, k:k + 1] * w1[k:k + 1, :]
    h1 = jnp.maximum(h1 + b1_ref[...], 0.0)

    # fc2 + ReLU (MXU; operands may be bf16, accumulation always f32)
    h2 = jnp.dot(h1.astype(w2_ref.dtype), w2_ref[...],
                 preferred_element_type=jnp.float32)
    h2 = jnp.maximum(h2 + b2_ref[...], 0.0)

    # fc3: output columns padded to a multiple of 128 (lane-dense unmasked store);
    # padded b3 columns are NEG_PAD so they never affect max/argmax.
    q = jnp.dot(h2.astype(w3_ref.dtype), w3_ref[...],
                preferred_element_type=jnp.float32) + b3_ref[...]
    return q


def _greedy_stats(q):
    """Row max and lowest-index argmax (over f32 q; padded cols hold NEG_PAD)."""
    col = lax.broadcasted_iota(jnp.int32, q.shape, 1)
    row_max = jnp.max(q, axis=-1, keepdims=True)
    idx = jnp.min(jnp.where(q >= row_max, col, q.shape[-1]),
                  axis=-1, keepdims=True)
    return col, idx, row_max


def _q_kernel(x_ref, w1_ref, b1_ref, w2_ref, b2_ref, w3_ref, b3_ref, q_ref, *,
              action_size):
    x = x_ref[...].astype(jnp.float32)
    q = _mlp_block(x, w1_ref, b1_ref, w2_ref, b2_ref, w3_ref, b3_ref)
    col, idx, row_max = _greedy_stats(q)
    # Fused epilogue: pack argmax (as float) and max_a Q into padded columns so
    # there is no second output stream.
    out = jnp.where(col == action_size, idx.astype(jnp.float32), q)
    out = jnp.where(col == action_size + 1, row_max, out)
    q_ref[...] = out.astype(q_ref.dtype)


def _act_kernel(x_ref, w1_ref, b1_ref, w2_ref, b2_ref, w3_ref, b3_ref, out_ref, *,
                action_size):
    del action_size  # argmax over all real columns; padded cols are NEG_PAD
    x = x_ref[...].astype(jnp.float32)
    q = _mlp_block(x, w1_ref, b1_ref, w2_ref, b2_ref, w3_ref, b3_ref)
    _, idx, row_max = _greedy_stats(q)
    out_ref[...] = jnp.concatenate([idx.astype(jnp.float32), row_max], axis=-1)


# ----------------------------- host wrappers --------------------------------

def _choose_tile_b(batch, tile_b):
    if tile_b is None:
        # Aim for >= 2 grid steps once the batch spans more than one base tile so
        # the "parallel" batch axis can shard across both TensorCores on v7x.
        half = _round_up(max(pl.cdiv(max(batch, 1), 2), 1), 8)
        tile_b = min(TILE_B_MAX, max(8, half))
    return _round_up(tile_b, 8)


def _pallas_forward(kernel, x, params, out_cols, out_dtype, tile_b):
    w1, b1, w2, b2, w3, b3 = params
    batch, state_size = x.shape
    hidden = w1.shape[1]
    padded_actions = w3.shape[1]

    tile_b = _choose_tile_b(batch, tile_b)
    padded_b = _round_up(max(batch, 1), tile_b)
    if padded_b != batch:
        x = jnp.pad(x, ((0, padded_b - batch), (0, 0)))

    grid = (padded_b // tile_b,)
    resident = lambda i: (0, 0)   # weights/biases: same block every grid step

    out = pl.pallas_call(
        kernel,
        grid=grid,
        in_specs=[
            pl.BlockSpec((tile_b, state_size), lambda i: (i, 0)),  # x (batch tiled)
            pl.BlockSpec((state_size, hidden), resident),          # w1
            pl.BlockSpec((1, hidden), resident),                   # b1
            pl.BlockSpec((hidden, hidden), resident),              # w2
            pl.BlockSpec((1, hidden), resident),                   # b2
            pl.BlockSpec((hidden, padded_actions), resident),      # w3 (padded)
            pl.BlockSpec((1, padded_actions), resident),           # b3 (padded)
        ],
        out_specs=pl.BlockSpec((tile_b, out_cols), lambda i: (i, 0)),
        out_shape=jax.ShapeDtypeStruct((padded_b, out_cols), out_dtype),
        compiler_params=pltpu.CompilerParams(
            dimension_semantics=("parallel",),   # megacore sharding on v7x
        ),
    )(x, w1, b1, w2, b2, w3, b3)
    return out, batch


def qnetwork_forward_and_greedy(x, params, action_size, *, q_dtype=jnp.float32,
                                tile_b=None, slice_outputs=True):
    """x: [B, state_size] -> (q [B, A], greedy [B] int32, max_a Q [B] f32).

    With slice_outputs=False the padded [B_pad, PAD_A] slab is returned directly
    (column `action_size` = greedy action as float, `action_size+1` = max_a Q) so
    downstream consumers can index lazily without a dense re-materializing slice."""
    w3 = params[4]
    assert w3.shape[1] >= action_size + 2, "need 2 spare padded columns for packing"
    kernel = functools.partial(_q_kernel, action_size=action_size)
    q_pad, batch = _pallas_forward(kernel, x, params, w3.shape[1], q_dtype, tile_b)
    if not slice_outputs:
        return q_pad
    q = q_pad[:batch, :action_size]
    greedy = q_pad[:batch, action_size].astype(jnp.int32)
    qmax = q_pad[:batch, action_size + 1].astype(jnp.float32)
    return q, greedy, qmax


def qnetwork_forward(x, params, action_size, **kw):
    """Module-equivalent forward: Q-values [B, action_size]."""
    q, _, _ = qnetwork_forward_and_greedy(x, params, action_size, **kw)
    return q


def qnetwork_act(x, params, action_size, *, tile_b=None):
    """Acting / TD-target path: only (greedy action, max_a Q) per row.
    Skips the padded Q slab writeback entirely (~8 B/row instead of ~512 B/row)."""
    kernel = functools.partial(_act_kernel, action_size=action_size)
    out, batch = _pallas_forward(kernel, x, params, 2, jnp.float32, tile_b)
    return out[:batch, 0].astype(jnp.int32), out[:batch, 1]


# ------------------------------- init ---------------------------------------

def init_linear(key, fan_in, fan_out, *, out_pad=None, bias_pad_value=0.0,
                weight_dtype=jnp.float32):
    """PyTorch nn.Linear default init U(-1/sqrt(fan_in), 1/sqrt(fan_in)).
    Weight is pre-transposed to [fan_in, fan_out]; optional zero-padded columns."""
    kw, kb = jax.random.split(key)
    bound = 1.0 / math.sqrt(fan_in)
    w = jax.random.uniform(kw, (fan_in, fan_out), jnp.float32, -bound, bound)
    b = jax.random.uniform(kb, (1, fan_out), jnp.float32, -bound, bound)
    if out_pad is not None and out_pad > fan_out:
        w = jnp.pad(w, ((0, 0), (0, out_pad - fan_out)))
        b = jnp.pad(b, ((0, 0), (0, out_pad - fan_out)),
                    constant_values=bias_pad_value)
    return w.astype(weight_dtype), b


def init_qnetwork(key, state_size, action_size, hidden=HIDDEN,
                  matmul_dtype=jnp.float32):
    k1, k2, k3 = jax.random.split(key, 3)
    w1, b1 = init_linear(k1, state_size, hidden)            # f32 (VPU fc1 path)
    w2, b2 = init_linear(k2, hidden, hidden, weight_dtype=matmul_dtype)
    # final layer padded to a multiple of 128 output columns; reserve 2 padded
    # columns for the fused (argmax, max) epilogue; padded biases get NEG_PAD.
    pad_a = _round_up(action_size + 2, LANE)
    w3, b3 = init_linear(k3, hidden, action_size, out_pad=pad_a,
                         bias_pad_value=NEG_PAD, weight_dtype=matmul_dtype)
    return (w1, b1, w2, b2, w3, b3)


# ------------------------------- main ----------------------------------------

if __name__ == "__main__":
    key = jax.random.PRNGKey(0)
    k_params, k_x, k_x2 = jax.random.split(key, 3)

    # MountainCar-style sizes: state_size=2, action_size=3.
    state_size, action_size, batch = 2, 3, 8
    params = init_qnetwork(k_params, state_size, action_size)
    w1, b1, w2, b2, w3, b3 = params

    def ref_forward(xin):
        h = jnp.maximum(xin @ w1 + b1, 0.0)
        h = jnp.maximum(h @ w2.astype(jnp.float32) + b2, 0.0)
        return (h @ w3.astype(jnp.float32) + b3)[:, :action_size]

    # --- small batch, single grid step, exact f32 path ---
    x = jax.random.normal(k_x, (batch, state_size), jnp.float32)
    q, greedy, qmax = qnetwork_forward_and_greedy(x, params, action_size)
    jax.block_until_ready((q, greedy, qmax))
    ref = ref_forward(x)
    assert q.shape == (batch, action_size)
    assert jnp.allclose(q, ref, atol=1e-5), "q mismatch vs reference"
    assert jnp.array_equal(greedy, jnp.argmax(ref, axis=-1).astype(jnp.int32)), \
        "greedy-action mismatch vs reference"
    assert jnp.allclose(qmax, jnp.max(ref, axis=-1), atol=1e-5), "max-Q mismatch"

    # --- ragged batch / multi-tile grid (exercises padding + parallel axis) ---
    batch2 = 50
    x2 = jax.random.normal(k_x2, (batch2, state_size), jnp.float32)
    q2, g2, m2 = qnetwork_forward_and_greedy(x2, params, action_size, tile_b=16)
    jax.block_until_ready((q2, g2, m2))
    ref2 = ref_forward(x2)
    assert q2.shape == (batch2, action_size)
    assert jnp.allclose(q2, ref2, atol=1e-5), "q mismatch vs reference (tiled)"
    assert jnp.array_equal(g2, jnp.argmax(ref2, axis=-1).astype(jnp.int32)), \
        "greedy-action mismatch vs reference (tiled)"

    # --- act-only path (no Q slab writeback at all) ---
    g3, m3 = qnetwork_act(x2, params, action_size)
    jax.block_until_ready((g3, m3))
    assert jnp.array_equal(g3, jnp.argmax(ref2, axis=-1).astype(jnp.int32)), \
        "greedy-action mismatch (act path)"
    assert jnp.allclose(m3, jnp.max(ref2, axis=-1), atol=1e-5), "max-Q mismatch (act path)"

    # --- bf16 MXU weights + bf16 Q writeback (fast path), loose tolerance ---
    params_bf16 = init_qnetwork(k_params, state_size, action_size,
                                matmul_dtype=jnp.bfloat16)
    qb, gb, mb = qnetwork_forward_and_greedy(x2, params_bf16, action_size,
                                             q_dtype=jnp.bfloat16)
    jax.block_until_ready((qb, gb, mb))
    assert jnp.allclose(qb.astype(jnp.float32), ref2, atol=5e-2, rtol=5e-2), \
        "bf16 q path deviates too much from f32 reference"

    print("KERNEL_OK")
</pallas_src>

<mosaic_0001>
module attributes {stable_mosaic.version = 11 : i64} {
  func.func @_q_kernel(%arg0: i32, %arg1: memref<8x2xf32, #tpu.memory_space<vmem>>, %arg2: memref<2x64xf32, #tpu.memory_space<vmem>>, %arg3: memref<1x64xf32, #tpu.memory_space<vmem>>, %arg4: memref<64x64xf32, #tpu.memory_space<vmem>>, %arg5: memref<1x64xf32, #tpu.memory_space<vmem>>, %arg6: memref<64x128xf32, #tpu.memory_space<vmem>>, %arg7: memref<1x128xf32, #tpu.memory_space<vmem>>, %arg8: memref<8x128xf32, #tpu.memory_space<vmem>>) attributes {dimension_semantics = [#tpu.dimension_semantics<parallel>], iteration_bounds = array<i64: 1>, scalar_prefetch = 0 : i64, scratch_operands = 0 : i64, tpu.core_type = #tpu.core_type<tc>, window_params = [{transform_indices = @transform_0, window_bounds = array<i64: 8, 2>}, {pipeline_mode = #tpu.pipeline_mode<synchronous>, transform_indices = @transform_1, window_bounds = array<i64: 2, 64>}, {pipeline_mode = #tpu.pipeline_mode<synchronous>, transform_indices = @transform_2, window_bounds = array<i64: 1, 64>}, {pipeline_mode = #tpu.pipeline_mode<synchronous>, transform_indices = @transform_3, window_bounds = array<i64: 64, 64>}, {pipeline_mode = #tpu.pipeline_mode<synchronous>, transform_indices = @transform_4, window_bounds = array<i64: 1, 64>}, {pipeline_mode = #tpu.pipeline_mode<synchronous>, transform_indices = @transform_5, window_bounds = array<i64: 64, 128>}, {pipeline_mode = #tpu.pipeline_mode<synchronous>, transform_indices = @transform_6, window_bounds = array<i64: 1, 128>}, {transform_indices = @transform_7, window_bounds = array<i64: 8, 128>}]} {
    %c0 = arith.constant 0 : index
    %c0_0 = arith.constant 0 : index
    %0 = vector.load %arg1[%c0, %c0_0] : memref<8x2xf32, #tpu.memory_space<vmem>>, vector<8x2xf32>
    %c0_1 = arith.constant 0 : index
    %c0_2 = arith.constant 0 : index
    %1 = vector.load %arg2[%c0_1, %c0_2] : memref<2x64xf32, #tpu.memory_space<vmem>>, vector<2x64xf32>
    %2 = vector.extract_strided_slice %0 {offsets = [0, 0], sizes = [8, 1], strides = [1, 1]} : vector<8x2xf32> to vector<8x1xf32>
    %3 = vector.extract_strided_slice %1 {offsets = [0, 0], sizes = [1, 64], strides = [1, 1]} : vector<2x64xf32> to vector<1x64xf32>
    %4 = vector.broadcast %2 : vector<8x1xf32> to vector<8x64xf32>
    %5 = vector.broadcast %3 : vector<1x64xf32> to vector<8x64xf32>
    %6 = arith.mulf %4, %5 : vector<8x64xf32>
    %7 = vector.extract_strided_slice %0 {offsets = [0, 1], sizes = [8, 1], strides = [1, 1]} : vector<8x2xf32> to vector<8x1xf32>
    %8 = vector.extract_strided_slice %1 {offsets = [1, 0], sizes = [1, 64], strides = [1, 1]} : vector<2x64xf32> to vector<1x64xf32>
    %9 = vector.broadcast %7 : vector<8x1xf32> to vector<8x64xf32>
    %10 = vector.broadcast %8 : vector<1x64xf32> to vector<8x64xf32>
    %11 = arith.mulf %9, %10 : vector<8x64xf32>
    %12 = arith.addf %6, %11 : vector<8x64xf32>
    %c0_3 = arith.constant 0 : index
    %c0_4 = arith.constant 0 : index
    %13 = vector.load %arg3[%c0_3, %c0_4] : memref<1x64xf32, #tpu.memory_space<vmem>>, vector<1x64xf32>
    %14 = vector.broadcast %13 : vector<1x64xf32> to vector<8x64xf32>
    %15 = arith.addf %12, %14 : vector<8x64xf32>
    %cst = arith.constant 0.000000e+00 : f32
    %16 = vector.broadcast %cst : f32 to vector<8x64xf32>
    %17 = arith.maximumf %15, %16 : vector<8x64xf32>
    %c0_5 = arith.constant 0 : index
    %c0_6 = arith.constant 0 : index
    %18 = vector.load %arg4[%c0_5, %c0_6] : memref<64x64xf32, #tpu.memory_space<vmem>>, vector<64x64xf32>
    %cst_7 = arith.constant dense<0.000000e+00> : vector<8x64xf32>
    %19 = tpu.matmul %17, %18, %cst_7 {dimension_numbers = #tpu.dot_dimension_numbers<[1], [0], [0], [1], [0, 0, 1, 1], [], []>} : vector<8x64xf32>, vector<64x64xf32>, vector<8x64xf32> -> vector<8x64xf32>
    %c0_8 = arith.constant 0 : index
    %c0_9 = arith.constant 0 : index
    %20 = vector.load %arg5[%c0_8, %c0_9] : memref<1x64xf32, #tpu.memory_space<vmem>>, vector<1x64xf32>
    %21 = vector.broadcast %20 : vector<1x64xf32> to vector<8x64xf32>
    %22 = arith.addf %19, %21 : vector<8x64xf32>
    %cst_10 = arith.constant 0.000000e+00 : f32
    %23 = vector.broadcast %cst_10 : f32 to vector<8x64xf32>
    %24 = arith.maximumf %22, %23 : vector<8x64xf32>
    %c0_11 = arith.constant 0 : index
    %c0_12 = arith.constant 0 : index
    %25 = vector.load %arg6[%c0_11, %c0_12] : memref<64x128xf32, #tpu.memory_space<vmem>>, vector<64x128xf32>
    %cst_13 = arith.constant dense<0.000000e+00> : vector<8x128xf32>
    %26 = tpu.matmul %24, %25, %cst_13 {dimension_numbers = #tpu.dot_dimension_numbers<[1], [0], [0], [1], [0, 0, 1, 1], [], []>} : vector<8x64xf32>, vector<64x128xf32>, vector<8x128xf32> -> vector<8x128xf32>
    %c0_14 = arith.constant 0 : index
    %c0_15 = arith.constant 0 : index
    %27 = vector.load %arg7[%c0_14, %c0_15] : memref<1x128xf32, #tpu.memory_space<vmem>>, vector<1x128xf32>
    %28 = vector.broadcast %27 : vector<1x128xf32> to vector<8x128xf32>
    %29 = arith.addf %26, %28 : vector<8x128xf32>
    %30 = tpu.iota {dimensions = array<i32: 1>} : vector<8x128xi32>
    %cst_16 = arith.constant dense<0xFF800000> : vector<8xf32>
    %31 = vector.multi_reduction <maximumf>, %29, %cst_16 [1] : vector<8x128xf32> to vector<8xf32>
    %32 = vector.shape_cast %31 : vector<8xf32> to vector<8x1xf32>
    %33 = vector.broadcast %32 : vector<8x1xf32> to vector<8x128xf32>
    %34 = arith.cmpf oge, %29, %33 : vector<8x128xf32>
    %c128_i32 = arith.constant 128 : i32
    %35 = vector.broadcast %c128_i32 : i32 to vector<8x128xi32>
    %36 = arith.select %34, %30, %35 : vector<8x128xi1>, vector<8x128xi32>
    %cst_17 = arith.constant dense<2147483647> : vector<8xi32>
    %37 = vector.multi_reduction <minsi>, %36, %cst_17 [1] : vector<8x128xi32> to vector<8xi32>
    %38 = vector.shape_cast %37 : vector<8xi32> to vector<8x1xi32>
    %c3_i32 = arith.constant 3 : i32
    %39 = vector.broadcast %c3_i32 : i32 to vector<8x128xi32>
    %40 = arith.cmpi eq, %30, %39 : vector<8x128xi32>
    %41 = arith.sitofp %38 : vector<8x1xi32> to vector<8x1xf32>
    %42 = vector.shape_cast %41 : vector<8x1xf32> to vector<8x1xf32>
    %43 = vector.broadcast %42 : vector<8x1xf32> to vector<8x128xf32>
    %44 = arith.select %40, %43, %29 : vector<8x128xi1>, vector<8x128xf32>
    %c4_i32 = arith.constant 4 : i32
    %45 = vector.broadcast %c4_i32 : i32 to vector<8x128xi32>
    %46 = arith.cmpi eq, %30, %45 : vector<8x128xi32>
    %47 = vector.shape_cast %32 : vector<8x1xf32> to vector<8x1xf32>
    %48 = vector.broadcast %47 : vector<8x1xf32> to vector<8x128xf32>
    %49 = arith.select %46, %48, %44 : vector<8x128xi1>, vector<8x128xf32>
    %c0_18 = arith.constant 0 : index
    %c0_19 = arith.constant 0 : index
    %50 = vector.load %arg8[%c0_18, %c0_19] : memref<8x128xf32, #tpu.memory_space<vmem>>, vector<8x128xf32>
    tpu.vector_store %arg8[%c0_18, %c0_19], %49 {strides = array<i32>} : memref<8x128xf32, #tpu.memory_space<vmem>>, vector<8x128xf32>,
    return
  }
  func.func @transform_0(%arg0: i32) -> (i32, i32) {
    %c0_i32 = arith.constant 0 : i32
    %c0_i32_0 = arith.constant 0 : i32
    return %arg0, %c0_i32 : i32, i32
  }
  func.func @transform_1(%arg0: i32) -> (i32, i32) {
    %c0_i32 = arith.constant 0 : i32
    %c0_i32_0 = arith.constant 0 : i32
    %c0_i32_1 = arith.constant 0 : i32
    return %c0_i32, %c0_i32_0 : i32, i32
  }
  func.func @transform_2(%arg0: i32) -> (i32, i32) {
    %c0_i32 = arith.constant 0 : i32
    %c0_i32_0 = arith.constant 0 : i32
    %c0_i32_1 = arith.constant 0 : i32
    return %c0_i32, %c0_i32_0 : i32, i32
  }
  func.func @transform_3(%arg0: i32) -> (i32, i32) {
    %c0_i32 = arith.constant 0 : i32
    %c0_i32_0 = arith.constant 0 : i32
    %c0_i32_1 = arith.constant 0 : i32
    return %c0_i32, %c0_i32_0 : i32, i32
  }
  func.func @transform_4(%arg0: i32) -> (i32, i32) {
    %c0_i32 = arith.constant 0 : i32
    %c0_i32_0 = arith.constant 0 : i32
    %c0_i32_1 = arith.constant 0 : i32
    return %c0_i32, %c0_i32_0 : i32, i32
  }
  func.func @transform_5(%arg0: i32) -> (i32, i32) {
    %c0_i32 = arith.constant 0 : i32
    %c0_i32_0 = arith.constant 0 : i32
    %c0_i32_1 = arith.constant 0 : i32
    return %c0_i32, %c0_i32_0 : i32, i32
  }
  func.func @transform_6(%arg0: i32) -> (i32, i32) {
    %c0_i32 = arith.constant 0 : i32
    %c0_i32_0 = arith.constant 0 : i32
    %c0_i32_1 = arith.constant 0 : i32
    return %c0_i32, %c0_i32_0 : i32, i32
  }
  func.func @transform_7(%arg0: i32) -> (i32, i32) {
    %c0_i32 = arith.constant 0 : i32
    %c0_i32_0 = arith.constant 0 : i32
    return %arg0, %c0_i32 : i32, i32
  }
}

</mosaic_0001>

<bundles_post_ra>
// kernel: tpu_custom_call.1
= control target key start
LH: loop header
LB: loop body
LE: loop exit
PB: predicated region body
PF: predicated region fallthrough
CT: control target
= control target key end

     0   :  { %12 = vsyncpa [#allocation3], 0  ;;  %s576_s0 = inlined_call_operand.vmem [shape: f32[8,2], index: 0, kind: input, shape index: {}]   ;;  %s577_s1 = inlined_call_operand.vmem [shape: f32[2,64], index: 1, kind: input, shape index: {}]   ;;  %s578_s2 = inlined_call_operand.vmem [shape: f32[1,64], index: 2, kind: input, shape index: {}]   ;;  %s579_s3 = inlined_call_operand.hbm [shape: f32[64,64], index: 3, kind: input, shape index: {}]   ;;  %s580_s4 = inlined_call_operand.vmem [shape: f32[1,64], index: 4, kind: input, shape index: {}]   ;;  %s581_s5 = inlined_call_operand.hbm [shape: f32[64,128], index: 5, kind: input, shape index: {}]   ;;  %s582_s6 = inlined_call_operand.vmem [shape: f32[1,128], index: 6, kind: input, shape index: {}]   ;;  %s583_s7 = inlined_call_operand.hbm [shape: f32[8,128], index: 7, kind: output, shape index: {}]  }
   0x1   :  { %13 = vsyncpa [#allocation6], 0 }
   0x2   :  { %14 = vsyncpa [#allocation4], 0  ;;  %s475_s24 = smov [#allocation2]   ;;  %s403_s28 = scalar_lea.hbm %s579_s3, 1024 }
   0x3   :  { %s26_s25 = sshll.u32 %s475_s24, 4  ;;  %p404_p0 = scmp.ne.s32.totalorder %s579_s3, %s403_s28  ;;  %s27_s25 = int_to_ptr.vmem [resolvable:$true] %s26_s25 }
   0x4   :  { %p407_p1 = scmp.lt.u32.totalorder %s403_s28, %s579_s3 }
   0x6   :  { %p409_p2 = pnand %p407_p1, %p404_p0 }
   0x8   :  { %412 = shalt.err (!%p409_p2)
}
   0x9   :  { %s413_s10 = scalar_lea.vmem %s27_s25, 1024  ;;  %p418_p4 = scmp.lt.s32.totalorder %s27_s25, %s27_s25 }
   0xa   :  { %p414_p3 = scmp.ne.s32.totalorder %s27_s25, %s413_s10  ;;  %p419_p5 = scmp.lt.s32.totalorder %s413_s10, %s413_s10 }
   0xc   :  { %p420_p6 = por %p419_p5, %p418_p4 }
   0xe   :  { %p421_p7 = pnand %p420_p6, %p414_p3 }
  0x10   :  { %424 = shalt.err (!%p421_p7)
}
  0x11   :  { %s476_s11 = smov 128   ;;  %s477_s12 = smov 8  }
  0x12   :  { %32 = dma.hbm_to_vmem [thread:$0]  %s579_s3, 1024, %s27_s25, [#allocation3], %s476_s11, %s476_s11, %s477_s12  }
  0x13   :  { %s478_s15 = smov [#allocation5]   ;;  %s425_s19 = scalar_lea.hbm %s581_s5, 1024 }
  0x14   :  { %s40_s16 = sshll.u32 %s478_s15, 4  ;;  %p426_p8 = scmp.ne.s32.totalorder %s581_s5, %s425_s19  ;;  %s41_s16 = int_to_ptr.vmem [resolvable:$true] %s40_s16 }
  0x15   :  { %p429_p9 = scmp.lt.u32.totalorder %s425_s19, %s581_s5 }
  0x17   :  { %p431_p10 = pnand %p429_p9, %p426_p8 }
  0x19   :  { %434 = shalt.err (!%p431_p10)
}
  0x1a   :  { %s435_s24 = scalar_lea.vmem %s41_s16, 1024  ;;  %p440_p12 = scmp.lt.s32.totalorder %s41_s16, %s41_s16 }
  0x1b   :  { %p436_p11 = scmp.ne.s32.totalorder %s41_s16, %s435_s24  ;;  %p441_p13 = scmp.lt.s32.totalorder %s435_s24, %s435_s24 }
  0x1d   :  { %p442_p0 = por %p441_p13, %p440_p12 }
  0x1f   :  { %p443_p1 = pnand %p442_p0, %p436_p11 }
  0x21   :  { %446 = shalt.err (!%p443_p1)
}
  0x22   :  { %46 = dma.hbm_to_vmem [thread:$0]  %s581_s5, 1024, %s41_s16, [#allocation6], %s476_s11, %s476_s11, %s477_s12  }
  0x23   :  { %469 = dma.done.wait [#allocation3], 1024  }
  0x24   :  { %470 = vsyncadd [#allocation3], 4294966272 }
  0x25   :  { %471 = dma.done.wait [#allocation6], 1024  }
  0x26   :  { %472 = vsyncadd [#allocation6], 4294966272  ;;  %v479_v0 = vmov 0   ;;  %v480_v1 = vmov 0.0|0.0   ;;  %v55_v2 = vld [vmem:[%s576_s0] sm:$0xff]  ;;  %v87_v4 = vld [vmem:[#allocation2 + $0x8] sm:$0xff]  ;;  %v62_v26 = vlaneseq }
  0x27   :  { %401 = vset.pattern.permute.xlu0 %v479_v0  ;;  %367 = vmatprep.subr.bf16.mxu0 %v480_v1  ;;  %v86_v3 = vld [vmem:[#allocation2] sm:$0xff]  ;;  %v88_v6 = vld [vmem:[#allocation2 + $0x10] sm:$0xff]  ;;  %v89_v7 = vld [vmem:[#allocation2 + $0x18] sm:$0xff]  ;;  %v481_v11 = vmov 1   ;;  %vm482_vm0 = vmmov 0   ;;  %v483_v16 = vmov 0.0  }
  0x28   :  { %379 = vmatprep.subr.bf16.mxu1 %v480_v1  ;;  %59 = vperm.xlu0 %401, %v55_v2   ;;  %v368_v5 = vpack.c.bf16 %v87_v4, %v86_v3  ;;  %v371_v8 = vpack.c.bf16 %v89_v7, %v88_v6  ;;  %v90_v9 = vld [vmem:[#allocation2 + $0x20] sm:$0xff]  ;;  %v91_v10 = vld [vmem:[#allocation2 + $0x28] sm:$0xff]  ;;  %v92_v13 = vld [vmem:[#allocation2 + $0x30] sm:$0xff]  ;;  %v63_v27 = vshrl.u32 %v62_v26, 7  ;;  %vm101_vm1 = vcmask 523264  }
  0x29   :  { %v374_v12 = vpack.c.bf16 %v91_v10, %v90_v9  ;;  %v93_v14 = vld [vmem:[#allocation2 + $0x38] sm:$0xff]  ;;  %345 = vmatprep.mubr.msk.f32.mxu0 %vm482_vm0, %v483_v16  ;;  %364 = vmatprep.mubr.msk.f32.mxu1 %vm482_vm0, %v483_v16  ;;  %v176_v17 = vld [vmem:[#allocation5] sm:$0xff]  ;;  %v177_v18 = vld [vmem:[#allocation5 + $0x8] sm:$0xff]  ;;  %v265_v53 = vand.u32 127, %v62_v26 }
  0x2a   :  { %369 = vmatpush3.bf16.msra.mxu0 %v368_v5  ;;  %v377_v15 = vpack.c.bf16 %v93_v14, %v92_v13  ;;  %v178_v19 = vld [vmem:[#allocation5 + $0x10] sm:$0xff]  ;;  %v380_v20 = vpack.c.bf16 %v177_v18, %v176_v17  ;;  %v179_v21 = vld [vmem:[#allocation5 + $0x18] sm:$0xff]  ;;  %v180_v23 = vld [vmem:[#allocation5 + $0x20] sm:$0xff]  ;;  %v64_v28 = vsub.s32 0, %v63_v27  ;;  %v73_v29 = vsub.s32 1, %v63_v27 }
  0x2b   :  { %370 = vmatprep.subr.bf16.mxu0 %v480_v1  ;;  %v383_v22 = vpack.c.bf16 %v179_v21, %v178_v19  ;;  %v181_v24 = vld [vmem:[#allocation5 + $0x28] sm:$0xff]  ;;  %v56_v30 = vld [vmem:[%s577_s1] sm:$0x3]  ;;  %v182_v41 = vld [vmem:[#allocation5 + $0x30] sm:$0xff]  ;;  %vm284_vm4 = vcmp.eq.s32.totalorder %v265_v53, 3  ;;  %vm287_vm5 = vcmp.eq.s32.totalorder %v265_v53, 4 }
  0x2c   :  { %402 = vset.pattern.permute.xlu0 %v481_v11  ;;  %381 = vmatpush3.bf16.msra.mxu1 %v380_v20  ;;  %v386_v25 = vpack.c.bf16 %v181_v24, %v180_v23  ;;  %v65_v32 = vrot.slane %v56_v30, %v64_v28  ;;  %v74_v33 = vrot.slane %v56_v30, %v73_v29  ;;  %v306_v37 = vld [vmem:[%s578_s2] ss:$0 sm:$0xff]  ;;  %v183_v42 = vld [vmem:[#allocation5 + $0x38] sm:$0xff] }
  0x2d   :  { %68 = vperm.xlu0 %402, %v55_v2   ;;  %382 = vmatprep.subr.bf16.mxu1 %v480_v1  ;;  %v389_v43 = vpack.c.bf16 %v183_v42, %v182_v41  ;;  %v307_v44 = vld [vmem:[%s580_s4] ss:$0 sm:$0xff]  ;;  %s484_s4 = smov [#allocation7]  }
  0x2e   :  { %372 = vmatpush3.bf16.msra.mxu0 %v371_v8  ;;  %v309_v49 = vld [vmem:[%s582_s6] ss:$0 sm:$0xff]  ;;  %s296_s6 = sshll.u32 %s484_s4, 4  ;;  %s297_s6 = int_to_ptr.vmem [resolvable:$true] %s296_s6 }
  0x2f   :  { %373 = vmatprep.subr.bf16.mxu0 %v480_v1  ;;  %s447_s9 = scalar_lea.vmem %s297_s6, 128  ;;  %p452_p3 = scmp.lt.s32.totalorder %s297_s6, %s297_s6 }
  0x30   :  { %384 = vmatpush3.bf16.msra.mxu1 %v383_v22  ;;  %p448_p2 = scmp.ne.s32.totalorder %s297_s6, %s447_s9  ;;  %p453_p4 = scmp.lt.s32.totalorder %s447_s9, %s447_s9 }
  0x31   :  { %385 = vmatprep.subr.bf16.mxu1 %v480_v1 }
  0x32   :  { %375 = vmatpush3.bf16.msra.mxu0 %v374_v12  ;;  %p454_p5 = por %p453_p4, %p452_p3 }
  0x33   :  { %376 = vmatprep.subr.bf16.mxu0 %v480_v1 }
  0x34   :  { %387 = vmatpush3.bf16.msra.mxu1 %v386_v25  ;;  %p455_p6 = pnand %p454_p5, %p448_p2 }
  0x35   :  { %388 = vmatprep.subr.bf16.mxu1 %v480_v1 }
  0x36   :  { %378 = vmatpush3.bf16.msra.mxu0 %v377_v15 }
  0x38   :  { %390 = vmatpush3.bf16.msra.mxu1 %v389_v43 }
  0xa7   :  { %v60_v31 = vpop.permute.xlu0 %59 }
  0xa8   :  { %v66_v35 = vmul.f32 %v65_v32, %v60_v31 }
  0xac   :  { %v69_v34 = vpop.permute.xlu0 %68 }
  0xad   :  { %v75_v36 = vmul.f32 %v74_v33, %v69_v34 }
  0xaf   :  { %v76_v38 = vadd.f32 %v75_v36, %v66_v35 }
  0xb1   :  { %v84_v39 = vadd.f32 %v306_v37, %v76_v38 }
  0xb3   :  { %v85_v40 = vmax.f32 %v84_v39, 0.0 }
  0xb5   :  { %346 = vmatmul.mubr.msk.f32.vlgmr.msra.gmra.mrb[0].mxu0 %vm101_vm1, %v85_v40 }
 0x188   :  { %v171_v45 = vpop.f32.mrb[0].mxu0 }
 0x189   :  { %v172_v46 = vadd.f32 %v307_v44, %v171_v45  ;;  %v347_v47 = vpop.f32.mrb[1].mxu0 }
 0x18b   :  { %v175_v48 = vmax.f32 %v172_v46, 0.0 }
 0x18d   :  { %365 = vmatmul.mubr.msk.f32.vlgmr.msra.gmra.mrb[0].mxu1 %vm101_vm1, %v175_v48 }
 0x260   :  { %v260_v50 = vpop.f32.mrb[0].mxu1 }
 0x261   :  { %v261_v51 = vadd.f32 %v309_v49, %v260_v50  ;;  %v366_v52 = vpop.f32.mrb[1].mxu1 }
 0x263   :  { %266 = vmax.xlane.f32.xlu1 %v261_v51 }
 0x2f0   :  { %v267_v54 = vpop.xlane.xlu1 %266 }
 0x2f1   :  { %vm268_vm2 = vcmp.ge.f32.partialorder %v261_v51, %v267_v54 }
 0x2f2   :  { %v269_v55 = vsel %vm268_vm2, %v265_v53, 128 }
 0x2f3   :  { %v271_v56 = vshra.s32 %v269_v55, 16  ;;  %v270_v58 = vand.u32 65535, %v269_v55 }
 0x2f5   :  { %v273_v57 = vcvt.s32.f32 %v271_v56  ;;  %v272_v60 = vcvt.s32.f32 %v270_v58 }
 0x2f7   :  { %274 = vmin.xlane.f32.xlu1 %v273_v57 }
 0x384   :  { %v275_v59 = vpop.xlane.xlu1 %274 }
 0x385   :  { %vm276_vm3 = vcmp.eq.f32.partialorder %v273_v57, %v275_v59  ;;  %v281_v62 = vcvt.f32.s32 %v275_v59 }
 0x386   :  { %v277_v61 = vsel %vm276_vm3, %v272_v60, inf }
 0x387   :  { %278 = vmin.xlane.f32.xlu1 %v277_v61  ;;  %v282_v0 = vshll.u32 %v281_v62, 16 }
 0x414   :  { %v279_v63 = vpop.xlane.xlu1 %278 }
 0x415   :  { %v280_v1 = vcvt.f32.s32 %v279_v63 }
 0x417   :  { %v283_v2 = vadd.s32 %v282_v0, %v280_v1 }
 0x419   :  { %v285_v3 = vcvt.s32.f32 %v283_v2 }
 0x41b   :  { %v286_v4 = vsel %vm284_vm4, %v285_v3, %v261_v51 }
 0x41c   :  { %v288_v5 = vsel %vm287_vm5, %v267_v54, %v286_v4 }
 0x41d   :  { %289 = vst [vmem:[#allocation7] sm:$0xff] %v288_v5 }
 0x41e   :  { %458 = shalt.err (!%p455_p6)
}
 0x41f   :  { %s459_s12 = scalar_lea.hbm %s583_s7, 128 }
 0x420   :  { %p460_p7 = scmp.ne.s32.totalorder %s583_s7, %s459_s12  ;;  %p463_p8 = scmp.lt.u32.totalorder %s459_s12, %s583_s7 }
 0x422   :  { %p465_p9 = pnand %p463_p8, %p460_p7 }
 0x424   :  { %468 = shalt.err (!%p465_p9)
}
 0x425   :  { %299 = dma.vmem_to_hbm [thread:$0]  %s297_s6, 128, %s583_s7, [#allocation4]  }
 0x426   :  { %473 = dma.done.wait [#allocation4], 128  }
 0x427   :  { %474 = vsyncadd [#allocation4], 4294967168 }
 0x428   :  { %303 = vsyncpa [#allocation3], 1 }
 0x429   :  { %304 = vsyncpa [#allocation6], 1 }
 0x42a   :  { %305 = vsyncpa [#allocation4], 1 }

</bundles_post_ra>
